<compile_context>
chip_gen: v5e
topology: v5e:2x2
jax: 0.10.0
libtpu: 0.0.40
codegen_flags: <defaults>
</compile_context>

<pallas_src>
import math
import functools

import jax
import jax.numpy as jnp
from jax.experimental import pallas as pl
from jax.experimental.pallas import tpu as pltpu

_LANE = 128
_SUBLANE = 8
_MAX_TILE_M = 1024


def _round_up(v, m):
    return ((v + m - 1) // m) * m


def _make_mlp_kernel(n_hidden: int, negative_slope: float):
    """Kernel refs: (x, w0, b0, ..., w_{H-1}, b_{H-1}, w_last, b_last, out).

    Hidden layers: Linear (bf16 MXU, f32 accumulate) -> LeakyReLU (f32 VPU)
    -> Dropout (identity in eval mode).  Final Linear(d, 1) is an
    einsum('od,td->ot') so the per-row scalar lands lane-major for an
    unmasked, lane-dense store.
    """

    def kernel(*refs):
        x_ref = refs[0]
        out_ref = refs[-1]
        h = x_ref[...]  # (tile_m, pacdim) f32 row tile
        for i in range(n_hidden):
            w = refs[1 + 2 * i][...]   # bf16 (d_in, d_out_pad)
            b = refs[2 + 2 * i][...]   # f32  (1, d_out_pad)
            h = jnp.dot(h.astype(jnp.bfloat16), w,
                        preferred_element_type=jnp.float32) + b
            h = jnp.maximum(h, negative_slope * h)  # LeakyReLU
            # Dropout(dropout_rate): identity in eval mode.
        w_last = refs[1 + 2 * n_hidden][...]  # (1, d_pad) bf16 row vector
        b_last = refs[2 + 2 * n_hidden][...]  # (1, 1) f32
        out_row = jnp.einsum("od,td->ot", w_last, h.astype(jnp.bfloat16),
                             preferred_element_type=jnp.float32) + b_last
        out_ref[...] = out_row.reshape(out_ref.shape).astype(out_ref.dtype)

    return kernel


def init_discriminator_params(key, input_dim, discriminator_dim, pac):
    """Xavier-normal weights (stored (in, out) for x @ W), zero biases (logical shapes)."""
    params = []
    dim = input_dim * pac
    dims = list(discriminator_dim) + [1]
    for out_dim in dims:
        key, sub = jax.random.split(key)
        std = math.sqrt(2.0 / (dim + out_dim))  # xavier_normal_, gain=1
        w = std * jax.random.normal(sub, (dim, out_dim), dtype=jnp.float32)
        b = jnp.zeros((1, out_dim), dtype=jnp.float32)
        params.append((w, b))
        dim = out_dim
    return params


def prepare_params(params):
    """One-time prep: hidden output dims zero-padded to 128 lanes, weights in bf16.

    The first layer's input dim stays at pacdim (it must match the streamed x
    feature extent).  Zero padding is exact: padded output columns get zero
    weight/bias -> zero activations that never contaminate later layers.  The
    final (d, 1) weight is stored as a (1, d_pad) bf16 row vector.
    """
    padded = []
    n = len(params)
    d_in_p = params[0][0].shape[0]  # pacdim, deliberately unpadded
    for i, (w, b) in enumerate(params):
        d_in, d_out = w.shape
        if i == n - 1:
            w_p = (jnp.zeros((1, d_in_p), jnp.float32)
                   .at[0, :d_in].set(w[:, 0]).astype(jnp.bfloat16))
            b_p = b.astype(jnp.float32).reshape(1, 1)
        else:
            d_out_p = _round_up(d_out, _LANE)
            w_p = (jnp.zeros((d_in_p, d_out_p), jnp.float32)
                   .at[:d_in, :d_out].set(w).astype(jnp.bfloat16))
            b_p = jnp.zeros((1, d_out_p), jnp.float32).at[:, :d_out].set(b)
            d_in_p = d_out_p
        padded.append(w_p)
        padded.append(b_p)
    return tuple(padded)


@functools.partial(jax.jit, static_argnames=("pac", "negative_slope"))
def discriminator_forward(x, padded_params, *, pac, negative_slope):
    """x: (N, input_dim), N % pac == 0  ->  (N // pac, 1) float32."""
    n, input_dim = x.shape
    assert n % pac == 0
    rows = n // pac
    pacdim = input_dim * pac

    # pac-stacking is a row-major dim merge -> no HBM copy; x streams as f32.
    xr = x.reshape(rows, pacdim)

    # Row tile: multiple of 8 sublanes, capped at _MAX_TILE_M and at ~rows/2 so
    # the "parallel" row axis has >= 2 steps to feed both v7x TensorCores.
    tile_m = _round_up(max(1, pl.cdiv(rows, 2)), _SUBLANE)
    tile_m = min(tile_m, _MAX_TILE_M)
    n_tiles = pl.cdiv(rows, tile_m)  # ragged last tile handled by Pallas; tail sliced off
    grid = (n_tiles,)

    n_layers = len(padded_params) // 2
    n_hidden = n_layers - 1
    kernel = _make_mlp_kernel(n_hidden, negative_slope)

    # x: row-tiled f32 stream.  Weights/biases: whole-array VMEM residents
    # (constant across the grid -> single-buffered, never re-DMA'd).
    in_specs = [pl.BlockSpec((tile_m, pacdim), lambda i: (i, 0))]
    in_specs += [pl.BlockSpec(memory_space=pltpu.MemorySpace.VMEM)
                 for _ in padded_params]
    # Lane-dense output: one (1, 1, tile_m) row per grid step.
    out_specs = pl.BlockSpec((1, 1, tile_m), lambda i: (i, 0, 0))
    out_shape = jax.ShapeDtypeStruct((n_tiles, 1, tile_m), jnp.float32)

    # Advisory cost estimate for the XLA scheduler.
    flops = 0
    d_prev = pacdim
    for li in range(n_hidden):
        d_out = padded_params[2 * li].shape[1]
        flops += 2 * rows * d_prev * d_out
        d_prev = d_out
    flops += 2 * rows * d_prev  # final row-vector product
    w_bytes = sum(int(p.size) * p.dtype.itemsize for p in padded_params)
    bytes_accessed = rows * pacdim * 4 + w_bytes + n_tiles * tile_m * 4
    cost = pl.CostEstimate(flops=flops, transcendentals=0,
                           bytes_accessed=bytes_accessed)

    # Generation-aware VMEM budget (v5e/v6e: 128 MiB, v7x: 64 MiB per TC).
    max_feat = max([pacdim] + [padded_params[2 * li].shape[1]
                               for li in range(n_hidden)])
    vmem_need = (
        2 * tile_m * pacdim * 4        # double-buffered x tiles (f32)
        + w_bytes                      # resident bf16 weights + f32 biases
        + 4 * tile_m * max_feat * 4    # f32 activation headroom
        + 2 * tile_m * 4               # double-buffered output rows
    )
    try:
        cap = pltpu.get_tpu_info().vmem_capacity_bytes
    except Exception:
        cap = 64 * 1024 * 1024
    vmem_limit = int(min(0.75 * cap, max(vmem_need + (4 << 20), 32 << 20)))

    out = pl.pallas_call(
        kernel,
        out_shape=out_shape,
        grid=grid,
        in_specs=in_specs,
        out_specs=out_specs,
        compiler_params=pltpu.CompilerParams(
            dimension_semantics=("parallel",),  # v7x: shard row tiles across TCs
            vmem_limit_bytes=vmem_limit,
        ),
        cost_estimate=cost,
    )(xr, *padded_params)
    return out.reshape(-1, 1)[:rows]


def _reference_forward(x, params, pac, negative_slope):
    """Pure-JAX reference mirroring the kernel's bf16-at-the-dot numerics."""
    rows = x.shape[0] // pac
    h = x.reshape(rows, -1).astype(jnp.float32)
    n = len(params)
    for i, (w, b) in enumerate(params):
        hb = h.astype(jnp.bfloat16).astype(jnp.float32)
        wb = w.astype(jnp.bfloat16).astype(jnp.float32)
        h = jnp.dot(hb, wb, precision=jax.lax.Precision.HIGHEST) + b
        if i < n - 1:
            h = jnp.maximum(h, negative_slope * h)
    return h


if __name__ == "__main__":
    key = jax.random.PRNGKey(0)

    # TODO(synk): Dropout is eval-mode identity; calc_gradient_penalty (autograd)
    # is not a forward op and is not implemented here.

    input_dim = 16
    discriminator_dim = (32, 32)
    negative_slope = 0.2

    # Check 1: small config, pac=2.
    pac = 2
    batch = 8  # divisible by pac
    k_x, k_p, key = jax.random.split(key, 3)
    x = jax.random.normal(k_x, (batch, input_dim), dtype=jnp.float32)
    params = init_discriminator_params(k_p, input_dim, discriminator_dim, pac)
    padded_params = prepare_params(params)
    out = discriminator_forward(x, padded_params, pac=pac,
                                negative_slope=negative_slope)
    out = jax.block_until_ready(out)
    ref = _reference_forward(x, params, pac, negative_slope)
    assert out.shape == (batch // pac, 1), out.shape
    assert jnp.allclose(out, ref, atol=2e-2, rtol=2e-2), (out, ref)

    # Check 2: default pac=10 (as in the PyTorch module signature).
    pac2 = 10
    batch2 = 40
    k_x2, k_p2, key = jax.random.split(key, 3)
    x2 = jax.random.normal(k_x2, (batch2, input_dim), dtype=jnp.float32)
    params2 = init_discriminator_params(k_p2, input_dim, discriminator_dim, pac2)
    padded_params2 = prepare_params(params2)
    out2 = discriminator_forward(x2, padded_params2, pac=pac2,
                                 negative_slope=negative_slope)
    out2 = jax.block_until_ready(out2)
    ref2 = _reference_forward(x2, params2, pac2, negative_slope)
    assert out2.shape == (batch2 // pac2, 1), out2.shape
    assert jnp.allclose(out2, ref2, atol=2e-2, rtol=2e-2), (out2, ref2)

    # Check 3: multi-tile grid with a ragged last row tile (OOB tail path).
    pac3 = 10
    batch3 = 3000  # rows = 300 -> tile_m = 152, 2 grid steps, 4 padded tail rows
    k_x3, k_p3, key = jax.random.split(key, 3)
    x3 = jax.random.normal(k_x3, (batch3, input_dim), dtype=jnp.float32)
    params3 = init_discriminator_params(k_p3, input_dim, discriminator_dim, pac3)
    padded_params3 = prepare_params(params3)
    out3 = discriminator_forward(x3, padded_params3, pac=pac3,
                                 negative_slope=negative_slope)
    out3 = jax.block_until_ready(out3)
    ref3 = _reference_forward(x3, params3, pac3, negative_slope)
    assert out3.shape == (batch3 // pac3, 1), out3.shape
    assert jnp.allclose(out3, ref3, atol=2e-2, rtol=2e-2)

    print("KERNEL_OK")
</pallas_src>

<mosaic_0001>
module attributes {stable_mosaic.version = 11 : i64} {
  func.func @kernel(%arg0: i32, %arg1: memref<8x32xf32, #tpu.memory_space<vmem>>, %arg2: memref<32x128xbf16, #tpu.memory_space<vmem>>, %arg3: memref<1x128xf32, #tpu.memory_space<vmem>>, %arg4: memref<128x128xbf16, #tpu.memory_space<vmem>>, %arg5: memref<1x128xf32, #tpu.memory_space<vmem>>, %arg6: memref<1x128xbf16, #tpu.memory_space<vmem>>, %arg7: memref<1x1xf32, #tpu.memory_space<vmem>>, %arg8: memref<1x1x8xf32, #tpu.memory_space<vmem>>) attributes {dimension_semantics = [#tpu.dimension_semantics<parallel>], iteration_bounds = array<i64: 1>, scalar_prefetch = 0 : i64, scratch_operands = 0 : i64, tpu.core_type = #tpu.core_type<tc>, window_params = [{transform_indices = @transform_0, window_bounds = array<i64: 8, 32>}, {pipeline_mode = #tpu.pipeline_mode<synchronous>, transform_indices = @transform_1, window_bounds = array<i64: 32, 128>}, {pipeline_mode = #tpu.pipeline_mode<synchronous>, transform_indices = @transform_2, window_bounds = array<i64: 1, 128>}, {pipeline_mode = #tpu.pipeline_mode<synchronous>, transform_indices = @transform_3, window_bounds = array<i64: 128, 128>}, {pipeline_mode = #tpu.pipeline_mode<synchronous>, transform_indices = @transform_4, window_bounds = array<i64: 1, 128>}, {pipeline_mode = #tpu.pipeline_mode<synchronous>, transform_indices = @transform_5, window_bounds = array<i64: 1, 128>}, {pipeline_mode = #tpu.pipeline_mode<synchronous>, transform_indices = @transform_6, window_bounds = array<i64: 1, 1>}, {transform_indices = @transform_7, window_bounds = array<i64: 1, 1, 8>}]} {
    %c0 = arith.constant 0 : index
    %c0_0 = arith.constant 0 : index
    %0 = vector.load %arg1[%c0, %c0_0] : memref<8x32xf32, #tpu.memory_space<vmem>>, vector<8x32xf32>
    %c0_1 = arith.constant 0 : index
    %c0_2 = arith.constant 0 : index
    %1 = vector.load %arg2[%c0_1, %c0_2] : memref<32x128xbf16, #tpu.memory_space<vmem>>, vector<32x128xbf16>
    %c0_3 = arith.constant 0 : index
    %c0_4 = arith.constant 0 : index
    %2 = vector.load %arg3[%c0_3, %c0_4] : memref<1x128xf32, #tpu.memory_space<vmem>>, vector<1x128xf32>
    %3 = arith.truncf %0 : vector<8x32xf32> to vector<8x32xbf16>
    %cst = arith.constant dense<0.000000e+00> : vector<8x128xf32>
    %4 = tpu.matmul %3, %1, %cst {dimension_numbers = #tpu.dot_dimension_numbers<[1], [0], [0], [1], [0, 0, 1, 1], [], []>} : vector<8x32xbf16>, vector<32x128xbf16>, vector<8x128xf32> -> vector<8x128xf32>
    %5 = vector.broadcast %2 : vector<1x128xf32> to vector<8x128xf32>
    %6 = arith.addf %4, %5 : vector<8x128xf32>
    %cst_5 = arith.constant 2.000000e-01 : f32
    %7 = vector.broadcast %cst_5 : f32 to vector<8x128xf32>
    %8 = arith.mulf %7, %6 : vector<8x128xf32>
    %9 = arith.maximumf %6, %8 : vector<8x128xf32>
    %c0_6 = arith.constant 0 : index
    %c0_7 = arith.constant 0 : index
    %10 = vector.load %arg4[%c0_6, %c0_7] : memref<128x128xbf16, #tpu.memory_space<vmem>>, vector<128x128xbf16>
    %c0_8 = arith.constant 0 : index
    %c0_9 = arith.constant 0 : index
    %11 = vector.load %arg5[%c0_8, %c0_9] : memref<1x128xf32, #tpu.memory_space<vmem>>, vector<1x128xf32>
    %12 = arith.truncf %9 : vector<8x128xf32> to vector<8x128xbf16>
    %cst_10 = arith.constant dense<0.000000e+00> : vector<8x128xf32>
    %13 = tpu.matmul %12, %10, %cst_10 {dimension_numbers = #tpu.dot_dimension_numbers<[1], [0], [0], [1], [0, 0, 1, 1], [], []>} : vector<8x128xbf16>, vector<128x128xbf16>, vector<8x128xf32> -> vector<8x128xf32>
    %14 = vector.broadcast %11 : vector<1x128xf32> to vector<8x128xf32>
    %15 = arith.addf %13, %14 : vector<8x128xf32>
    %cst_11 = arith.constant 2.000000e-01 : f32
    %16 = vector.broadcast %cst_11 : f32 to vector<8x128xf32>
    %17 = arith.mulf %16, %15 : vector<8x128xf32>
    %18 = arith.maximumf %15, %17 : vector<8x128xf32>
    %c0_12 = arith.constant 0 : index
    %c0_13 = arith.constant 0 : index
    %19 = vector.load %arg6[%c0_12, %c0_13] : memref<1x128xbf16, #tpu.memory_space<vmem>>, vector<1x128xbf16>
    %c0_14 = arith.constant 0 : index
    %c0_15 = arith.constant 0 : index
    %20 = vector.load %arg7[%c0_14, %c0_15] : memref<1x1xf32, #tpu.memory_space<vmem>>, vector<1x1xf32>
    %21 = arith.truncf %18 : vector<8x128xf32> to vector<8x128xbf16>
    "tpu.trace_start"() <{level = 10 : i32, message = "od,td->ot"}> : () -> ()
    %cst_16 = arith.constant dense<0.000000e+00> : vector<1x8xf32>
    %22 = tpu.matmul %19, %21, %cst_16 {dimension_numbers = #tpu.dot_dimension_numbers<[1], [1], [0], [0], [0, 0, 1, 0], [], []>} : vector<1x128xbf16>, vector<8x128xbf16>, vector<1x8xf32> -> vector<1x8xf32>
    "tpu.trace_stop"() : () -> ()
    %23 = vector.broadcast %20 : vector<1x1xf32> to vector<1x8xf32>
    %24 = arith.addf %22, %23 : vector<1x8xf32>
    %25 = vector.shape_cast %24 : vector<1x8xf32> to vector<1x1x8xf32>
    %c0_17 = arith.constant 0 : index
    %c0_18 = arith.constant 0 : index
    %c0_19 = arith.constant 0 : index
    %26 = vector.load %arg8[%c0_17, %c0_18, %c0_19] : memref<1x1x8xf32, #tpu.memory_space<vmem>>, vector<1x1x8xf32>
    tpu.vector_store %arg8[%c0_17, %c0_18, %c0_19], %25 {strides = array<i32>} : memref<1x1x8xf32, #tpu.memory_space<vmem>>, vector<1x1x8xf32>,
    return
  }
  func.func @transform_0(%arg0: i32) -> (i32, i32) {
    %c0_i32 = arith.constant 0 : i32
    %c0_i32_0 = arith.constant 0 : i32
    return %arg0, %c0_i32 : i32, i32
  }
  func.func @transform_1(%arg0: i32) -> (i32, i32) {
    %c0_i32 = arith.constant 0 : i32
    %c0_i32_0 = arith.constant 0 : i32
    %c0_i32_1 = arith.constant 0 : i32
    return %c0_i32, %c0_i32_0 : i32, i32
  }
  func.func @transform_2(%arg0: i32) -> (i32, i32) {
    %c0_i32 = arith.constant 0 : i32
    %c0_i32_0 = arith.constant 0 : i32
    %c0_i32_1 = arith.constant 0 : i32
    return %c0_i32, %c0_i32_0 : i32, i32
  }
  func.func @transform_3(%arg0: i32) -> (i32, i32) {
    %c0_i32 = arith.constant 0 : i32
    %c0_i32_0 = arith.constant 0 : i32
    %c0_i32_1 = arith.constant 0 : i32
    return %c0_i32, %c0_i32_0 : i32, i32
  }
  func.func @transform_4(%arg0: i32) -> (i32, i32) {
    %c0_i32 = arith.constant 0 : i32
    %c0_i32_0 = arith.constant 0 : i32
    %c0_i32_1 = arith.constant 0 : i32
    return %c0_i32, %c0_i32_0 : i32, i32
  }
  func.func @transform_5(%arg0: i32) -> (i32, i32) {
    %c0_i32 = arith.constant 0 : i32
    %c0_i32_0 = arith.constant 0 : i32
    %c0_i32_1 = arith.constant 0 : i32
    return %c0_i32, %c0_i32_0 : i32, i32
  }
  func.func @transform_6(%arg0: i32) -> (i32, i32) {
    %c0_i32 = arith.constant 0 : i32
    %c0_i32_0 = arith.constant 0 : i32
    %c0_i32_1 = arith.constant 0 : i32
    return %c0_i32, %c0_i32_0 : i32, i32
  }
  func.func @transform_7(%arg0: i32) -> (i32, i32, i32) {
    %c0_i32 = arith.constant 0 : i32
    %c0_i32_0 = arith.constant 0 : i32
    %c0_i32_1 = arith.constant 0 : i32
    return %arg0, %c0_i32, %c0_i32_0 : i32, i32, i32
  }
}

</mosaic_0001>

<bundles_post_ra>
// kernel: discriminator_forward.1
= control target key start
LH: loop header
LB: loop body
LE: loop exit
PB: predicated region body
PF: predicated region fallthrough
CT: control target
= control target key end

     0   :  { %s396_s0 = inlined_call_operand.vmem [shape: f32[4,32], index: 0, kind: input, shape index: {}]   ;;  %s397_s1 = inlined_call_operand.hbm [shape: bf16[32,128], index: 1, kind: input, shape index: {}]   ;;  %s398_s2 = inlined_call_operand.vmem [shape: f32[1,128], index: 2, kind: input, shape index: {}]   ;;  %s399_s3 = inlined_call_operand.hbm [shape: bf16[128,128], index: 3, kind: input, shape index: {}]   ;;  %s400_s4 = inlined_call_operand.vmem [shape: f32[1,128], index: 4, kind: input, shape index: {}]   ;;  %s401_s5 = inlined_call_operand.vmem [shape: bf16[1,128], index: 5, kind: input, shape index: {}]   ;;  %s402_s6 = inlined_call_operand.<no memory space> [shape: f32[1,1], index: 6, kind: input, shape index: {}]   ;;  %s403_s7 = inlined_call_operand.vmem [shape: f32[1,1,8], index: 7, kind: output, shape index: {}]  }
   0x1   :  { %v12_v0 = vstv %s402_s6 }
   0x2   :  { %13 = vst [vmem:[#allocation2] sm:$0x1] %v12_v0 }
   0x3   :  { %14 = vsyncpa [#allocation4], 0  ;;  %s22_s28 = sshll.u32 %s397_s1, 4  ;;  %s23_s28 = int_to_ptr.hbm [resolvable:$true] %s22_s28 }
   0x4   :  { %15 = vsyncpa [#allocation6], 0  ;;  %s327_s29 = smov [#allocation3]   ;;  %s37_s10 = sshll.u32 %s399_s3, 4  ;;  %s38_s10 = int_to_ptr.hbm [resolvable:$true] %s37_s10 }
   0x5   :  { %s24_s30 = sshll.u32 %s327_s29, 4  ;;  %s328_s11 = smov 64   ;;  %s25_s30 = int_to_ptr.vmem [resolvable:$true] %s24_s30 }
   0x6   :  { %s329_s12 = smov 4   ;;  %s330_s6 = smov [#allocation5]  }
   0x7   :  { %30 = dma.hbm_to_vmem [thread:$0]  %s23_s28, 256, %s25_s30, [#allocation4], %s328_s11, %s328_s11, %s329_s12  }
   0x8   :  { %s39_s13 = sshll.u32 %s330_s6, 4  ;;  %s40_s13 = int_to_ptr.vmem [resolvable:$true] %s39_s13 }
   0x9   :  { %45 = dma.hbm_to_vmem [thread:$0]  %s38_s10, 1024, %s40_s13, [#allocation6], %s328_s11, %s328_s11, %s329_s12  }
   0xa   :  { %323 = dma.done.wait [#allocation4], 256  }
   0xb   :  { %324 = vsyncadd [#allocation4], 4294967040 }
   0xc   :  { %325 = dma.done.wait [#allocation6], 1024  }
   0xd   :  { %326 = vsyncadd [#allocation6], 4294966272  ;;  %v258_v1 = vld [vmem:[#allocation3 + $0x8] sm:$0xff]  ;;  %v257_v3 = vld [vmem:[#allocation3] sm:$0xff]  ;;  %vm83_vm0 = vcmask 261120   ;;  %v331_v21 = vmov 0  }
   0xe   :  { %v266_v2 = vld [vmem:[#allocation5 + $0x38] sm:$0xff]  ;;  %93 = vmatpush.bf16.msra.mxu0 %v258_v1  ;;  %v61_v4 = vld [vmem:[%s396_s0] sm:$0xff]  ;;  %v263_v8 = vld [vmem:[#allocation5 + $0x20] sm:$0xff]  ;;  %272 = vset.pattern.permute.xlu0 %v331_v21  ;;  %vm208_vm1 = vcmask 57344  }
   0xf   :  { %171 = vmatpush.bf16.msra.mxu1 %v266_v2  ;;  %v265_v5 = vld [vmem:[#allocation5 + $0x30] sm:$0xff]  ;;  %v67_v6 = vpack.c.bf16 %v61_v4, %v61_v4  ;;  %v264_v7 = vld [vmem:[#allocation5 + $0x28] sm:$0xff]  ;;  %v262_v9 = vld [vmem:[#allocation5 + $0x18] sm:$0xff] }
  0x10   :  { %v261_v10 = vld [vmem:[#allocation5 + $0x10] sm:$0xff]  ;;  %v260_v11 = vld [vmem:[#allocation5 + $0x8] sm:$0xff]  ;;  %v259_v12 = vld [vmem:[#allocation5] sm:$0xff] }
  0x11   :  { %v273_v13 = vld [vmem:[%s398_s2] ss:$0 sm:$0xff] }
  0x12   :  { %94 = vmatpush.bf16.msra.mxu0 %v257_v3  ;;  %v187_v20 = vld [vmem:[#allocation2] sm:$0x1] }
  0x13   :  { %172 = vmatpush.bf16.msra.mxu1 %v265_v5  ;;  %191 = vperm.xlu0 %272, %v187_v20   ;;  %v274_v22 = vld [vmem:[%s400_s4] ss:$0 sm:$0xff] }
  0x14   :  { %v186_v29 = vld [vmem:[%s401_s5] sm:$0x1] }
  0x15   :  { %224 = vmatmul.msk.bf16.vlgmr.msra.gmra.mxu0 %vm83_vm0, %v67_v6 }
  0x17   :  { %173 = vmatpush.bf16.msra.mxu1 %v264_v7 }
  0x1b   :  { %174 = vmatpush.bf16.msra.mxu1 %v263_v8 }
  0x1f   :  { %175 = vmatpush.bf16.msra.mxu1 %v262_v9 }
  0x23   :  { %176 = vmatpush.bf16.msra.mxu1 %v261_v10 }
  0x27   :  { %177 = vmatpush.bf16.msra.mxu1 %v260_v11 }
  0x2b   :  { %178 = vmatpush.bf16.msra.mxu1 %v259_v12 }
  0x85   :  { %v192_v30 = vpop.permute.xlu0 %191 }
  0x86   :  { %v194_v31 = vperm.slane %v192_v30, 0 }
  0x92   :  { %v96_v14 = vpop.f32.mrf.mxu0 }
  0x93   :  { %v97_v15 = vadd.f32 %v273_v13, %v96_v14 }
  0x95   :  { %v100_v16 = vmul.f32 0.2, %v97_v15 }
  0x97   :  { %v101_v17 = vmax.f32 %v97_v15, %v100_v16 }
  0x99   :  { %v119_v18 = vpack.c.bf16 %v101_v17, %v101_v17 }
  0x9a   :  { %v98_v19 = vpop.f32.mrf.mxu0 }
  0x9b   :  { %179 = vmatmul.bf16.vlgmr.msra.gmra.mxu1 %v119_v18 }
 0x118   :  { %v180_v23 = vpop.f32.mrf.mxu1 }
 0x119   :  { %v181_v24 = vadd.f32 %v274_v22, %v180_v23 }
 0x11b   :  { %v184_v25 = vmul.f32 0.2, %v181_v24 }
 0x11d   :  { %v185_v26 = vmax.f32 %v181_v24, %v184_v25 }
 0x11f   :  { %v188_v27 = vpack.c.bf16 %v185_v26, %v185_v26 }
 0x120   :  { %v182_v28 = vpop.f32.mrf.mxu1 }
 0x121   :  { %202 = vmatpush.bf16.xpose.msra.mxu2 %v188_v27 }
 0x128   :  { %203 = vmatmul.bf16.vlgmr.msra.gmra.mxu2 %v186_v29 }
 0x1ab   :  { %v204_v32 = vpop.f32.mrf.mxu2 }
 0x1ac   :  { %v205_v33 = vadd.f32 %v204_v32, %v194_v31 }
 0x1ae   :  { %209 = vst.msk [vmem:[%s403_s7] sm:$0x1] %vm208_vm1, %v205_v33 }
 0x1b3   :  { %v206_v34 = vpop.f32.mrf.mxu2 }
 0x1b4   :  { %214 = vsyncpa [#allocation4], 1 }
 0x1b5   :  { %215 = vsyncpa [#allocation6], 1 }

</bundles_post_ra>
